<compile_context>
chip_gen: v6e
topology: v6e:2x2x1
jax: 0.10.0
libtpu: 0.0.40
codegen_flags: <defaults>
</compile_context>

<pallas_src>
import math

import jax
import jax.numpy as jnp
from jax.experimental import pallas as pl
from jax.experimental.pallas import tpu as pltpu


def policy_kernel(xt_ref, w1_ref, b1_ref, wh_ref, bh_ref, o_ref):
    xt = xt_ref[...]                     # (4, tb)   batch on lanes
    w1 = w1_ref[...]                     # (128, 4)  nn.Linear weight layout

    # Hidden layer on the VPU: K=4 -> 4 broadcast FMAs, bias folded in as the
    # accumulator init.  hT has shape (128, tb).
    h = b1_ref[...] + w1[:, 0:1] * xt[0:1, :]
    h = h + w1[:, 1:2] * xt[1:2, :]
    h = h + w1[:, 2:3] * xt[2:3, :]
    h = h + w1[:, 3:4] * xt[3:4, :]
    h = jnp.maximum(h, 0.0)              # ReLU

    # Fused heads on the MXU: (8, 128) @ (128, tb) -> (8, tb).
    # Rows 0-1 of wh/bh are the action head, row 2 the value head.
    o_ref[...] = jnp.dot(wh_ref[...], h,
                         preferred_element_type=jnp.float32) + bh_ref[...]


def pack_params(w1, b1, wa, ba, wv, bv):
    """One-time repack of nn.Linear params into kernel layouts (hoisted out of
    the forward path so it is not re-materialized every call).

    w1: (128, 4), b1: (128,), wa: (2, 128), ba: (2,), wv: (1, 128), bv: (1,).
    """
    w1 = jnp.asarray(w1, jnp.float32)                        # (128, 4)
    b1t = jnp.asarray(b1, jnp.float32).reshape(128, 1)       # (128, 1)
    wh = jnp.zeros((8, 128), jnp.float32)
    wh = wh.at[0:2, :].set(wa).at[2:3, :].set(wv)            # (8, 128)
    bh = jnp.zeros((8, 1), jnp.float32)
    bh = bh.at[0:2, 0].set(ba).at[2, 0].set(bv[0])           # (8, 1)
    return w1, b1t, wh, bh


def policy_forward(x, packed, *, tb_max=4096):
    """x: (B, 4) float32; packed = pack_params(...).
    Returns (action_logits (B, 2), value (B, 1))."""
    w1, b1t, wh, bh = packed
    B = x.shape[0]

    # Batch tiling: batch lives on lanes, so tiles are multiples of 128.
    # For large batches force >= 2 grid steps so v7x's two TensorCores share
    # the "parallel" axis; a single step is best for small, latency-bound B.
    n_steps = max(1, math.ceil(B / tb_max))
    if n_steps == 1 and B >= 1024:
        n_steps = 2
    tb = ((math.ceil(B / n_steps) + 127) // 128) * 128
    b_pad = n_steps * tb

    # Lane-dense (4, b_pad) input; padded columns are sliced away below.
    xt = x.T if b_pad == B else jnp.pad(x.T, ((0, 0), (0, b_pad - B)))

    out = pl.pallas_call(
        policy_kernel,
        out_shape=jax.ShapeDtypeStruct((8, b_pad), jnp.float32),
        grid=(n_steps,),
        in_specs=[
            pl.BlockSpec((4, tb), lambda i: (0, i)),      # xT tile (pipelined)
            pl.BlockSpec((128, 4), lambda i: (0, 0)),     # W1  (VMEM-resident)
            pl.BlockSpec((128, 1), lambda i: (0, 0)),     # b1
            pl.BlockSpec((8, 128), lambda i: (0, 0)),     # fused head weights
            pl.BlockSpec((8, 1), lambda i: (0, 0)),       # fused head bias
        ],
        out_specs=pl.BlockSpec((8, tb), lambda i: (0, i)),
        compiler_params=pltpu.CompilerParams(
            dimension_semantics=("parallel",)),
    )(xt, w1, b1t, wh, bh)

    # Slice the lane-dense (8, B) slab back into the module's two outputs.
    return out[0:2, :B].T, out[2:3, :B].T


def init_params(key):
    """Deterministic init matching nn.Linear: weight (out, in), bias (out,)."""
    ks = jax.random.split(key, 6)

    def lin(kw, kb, fan_in, fan_out):
        bound = 1.0 / math.sqrt(fan_in)
        w = jax.random.uniform(kw, (fan_out, fan_in), jnp.float32, -bound, bound)
        b = jax.random.uniform(kb, (fan_out,), jnp.float32, -bound, bound)
        return w, b

    w1, b1 = lin(ks[0], ks[1], 4, 128)
    wa, ba = lin(ks[2], ks[3], 128, 2)
    wv, bv = lin(ks[4], ks[5], 128, 1)
    return w1, b1, wa, ba, wv, bv


# TODO(synk): the module's log_probs/entropies/values/rewards lists and
# clear_action() are training-loop bookkeeping, not part of the forward pass.

if __name__ == "__main__":
    key = jax.random.PRNGKey(0)
    k_params, k_x = jax.random.split(key)
    w1, b1, wa, ba, wv, bv = init_params(k_params)
    packed = pack_params(w1, b1, wa, ba, wv, bv)   # one-time head packing

    B = 8  # small batch
    x = jax.random.normal(k_x, (B, 4), dtype=jnp.float32)

    a_logits, value = policy_forward(x, packed)
    jax.block_until_ready((a_logits, value))

    # Pure-JAX reference (PyTorch semantics: y = x @ W.T + b)
    h_ref = jnp.maximum(x @ w1.T + b1, 0.0)
    a_ref = h_ref @ wa.T + ba
    v_ref = h_ref @ wv.T + bv
    assert a_logits.shape == (B, 2) and value.shape == (B, 1)
    assert jnp.allclose(a_logits, a_ref, atol=1e-5)
    assert jnp.allclose(value, v_ref, atol=1e-5)

    print("KERNEL_OK")
</pallas_src>

<mosaic_0001>
module attributes {stable_mosaic.version = 11 : i64} {
  func.func @policy_kernel(%arg0: i32, %arg1: memref<4x128xf32, #tpu.memory_space<vmem>>, %arg2: memref<128x4xf32, #tpu.memory_space<vmem>>, %arg3: memref<128x1xf32, #tpu.memory_space<vmem>>, %arg4: memref<8x128xf32, #tpu.memory_space<vmem>>, %arg5: memref<8x1xf32, #tpu.memory_space<vmem>>, %arg6: memref<8x128xf32, #tpu.memory_space<vmem>>) attributes {dimension_semantics = [#tpu.dimension_semantics<parallel>], iteration_bounds = array<i64: 1>, scalar_prefetch = 0 : i64, scratch_operands = 0 : i64, tpu.core_type = #tpu.core_type<tc>, window_params = [{transform_indices = @transform_0, window_bounds = array<i64: 4, 128>}, {pipeline_mode = #tpu.pipeline_mode<synchronous>, transform_indices = @transform_1, window_bounds = array<i64: 128, 4>}, {pipeline_mode = #tpu.pipeline_mode<synchronous>, transform_indices = @transform_2, window_bounds = array<i64: 128, 1>}, {pipeline_mode = #tpu.pipeline_mode<synchronous>, transform_indices = @transform_3, window_bounds = array<i64: 8, 128>}, {pipeline_mode = #tpu.pipeline_mode<synchronous>, transform_indices = @transform_4, window_bounds = array<i64: 8, 1>}, {transform_indices = @transform_5, window_bounds = array<i64: 8, 128>}]} {
    %c0 = arith.constant 0 : index
    %c0_0 = arith.constant 0 : index
    %0 = vector.load %arg1[%c0, %c0_0] : memref<4x128xf32, #tpu.memory_space<vmem>>, vector<4x128xf32>
    %c0_1 = arith.constant 0 : index
    %c0_2 = arith.constant 0 : index
    %1 = vector.load %arg2[%c0_1, %c0_2] : memref<128x4xf32, #tpu.memory_space<vmem>>, vector<128x4xf32>
    %c0_3 = arith.constant 0 : index
    %c0_4 = arith.constant 0 : index
    %2 = vector.load %arg3[%c0_3, %c0_4] : memref<128x1xf32, #tpu.memory_space<vmem>>, vector<128x1xf32>
    %3 = vector.extract_strided_slice %1 {offsets = [0, 0], sizes = [128, 1], strides = [1, 1]} : vector<128x4xf32> to vector<128x1xf32>
    %4 = vector.extract_strided_slice %0 {offsets = [0, 0], sizes = [1, 128], strides = [1, 1]} : vector<4x128xf32> to vector<1x128xf32>
    %5 = vector.broadcast %3 : vector<128x1xf32> to vector<128x128xf32>
    %6 = vector.broadcast %4 : vector<1x128xf32> to vector<128x128xf32>
    %7 = arith.mulf %5, %6 : vector<128x128xf32>
    %8 = vector.broadcast %2 : vector<128x1xf32> to vector<128x128xf32>
    %9 = arith.addf %8, %7 : vector<128x128xf32>
    %10 = vector.extract_strided_slice %1 {offsets = [0, 1], sizes = [128, 1], strides = [1, 1]} : vector<128x4xf32> to vector<128x1xf32>
    %11 = vector.extract_strided_slice %0 {offsets = [1, 0], sizes = [1, 128], strides = [1, 1]} : vector<4x128xf32> to vector<1x128xf32>
    %12 = vector.broadcast %10 : vector<128x1xf32> to vector<128x128xf32>
    %13 = vector.broadcast %11 : vector<1x128xf32> to vector<128x128xf32>
    %14 = arith.mulf %12, %13 : vector<128x128xf32>
    %15 = arith.addf %9, %14 : vector<128x128xf32>
    %16 = vector.extract_strided_slice %1 {offsets = [0, 2], sizes = [128, 1], strides = [1, 1]} : vector<128x4xf32> to vector<128x1xf32>
    %17 = vector.extract_strided_slice %0 {offsets = [2, 0], sizes = [1, 128], strides = [1, 1]} : vector<4x128xf32> to vector<1x128xf32>
    %18 = vector.broadcast %16 : vector<128x1xf32> to vector<128x128xf32>
    %19 = vector.broadcast %17 : vector<1x128xf32> to vector<128x128xf32>
    %20 = arith.mulf %18, %19 : vector<128x128xf32>
    %21 = arith.addf %15, %20 : vector<128x128xf32>
    %22 = vector.extract_strided_slice %1 {offsets = [0, 3], sizes = [128, 1], strides = [1, 1]} : vector<128x4xf32> to vector<128x1xf32>
    %23 = vector.extract_strided_slice %0 {offsets = [3, 0], sizes = [1, 128], strides = [1, 1]} : vector<4x128xf32> to vector<1x128xf32>
    %24 = vector.broadcast %22 : vector<128x1xf32> to vector<128x128xf32>
    %25 = vector.broadcast %23 : vector<1x128xf32> to vector<128x128xf32>
    %26 = arith.mulf %24, %25 : vector<128x128xf32>
    %27 = arith.addf %21, %26 : vector<128x128xf32>
    %cst = arith.constant 0.000000e+00 : f32
    %28 = vector.broadcast %cst : f32 to vector<128x128xf32>
    %29 = arith.maximumf %27, %28 : vector<128x128xf32>
    %c0_5 = arith.constant 0 : index
    %c0_6 = arith.constant 0 : index
    %30 = vector.load %arg4[%c0_5, %c0_6] : memref<8x128xf32, #tpu.memory_space<vmem>>, vector<8x128xf32>
    %cst_7 = arith.constant dense<0.000000e+00> : vector<8x128xf32>
    %31 = tpu.matmul %30, %29, %cst_7 {dimension_numbers = #tpu.dot_dimension_numbers<[1], [0], [0], [1], [0, 0, 1, 1], [], []>} : vector<8x128xf32>, vector<128x128xf32>, vector<8x128xf32> -> vector<8x128xf32>
    %c0_8 = arith.constant 0 : index
    %c0_9 = arith.constant 0 : index
    %32 = vector.load %arg5[%c0_8, %c0_9] : memref<8x1xf32, #tpu.memory_space<vmem>>, vector<8x1xf32>
    %33 = vector.broadcast %32 : vector<8x1xf32> to vector<8x128xf32>
    %34 = arith.addf %31, %33 : vector<8x128xf32>
    %c0_10 = arith.constant 0 : index
    %c0_11 = arith.constant 0 : index
    %35 = vector.load %arg6[%c0_10, %c0_11] : memref<8x128xf32, #tpu.memory_space<vmem>>, vector<8x128xf32>
    tpu.vector_store %arg6[%c0_10, %c0_11], %34 {strides = array<i32>} : memref<8x128xf32, #tpu.memory_space<vmem>>, vector<8x128xf32>,
    return
  }
  func.func @transform_0(%arg0: i32) -> (i32, i32) {
    %c0_i32 = arith.constant 0 : i32
    %c0_i32_0 = arith.constant 0 : i32
    return %c0_i32, %arg0 : i32, i32
  }
  func.func @transform_1(%arg0: i32) -> (i32, i32) {
    %c0_i32 = arith.constant 0 : i32
    %c0_i32_0 = arith.constant 0 : i32
    %c0_i32_1 = arith.constant 0 : i32
    return %c0_i32, %c0_i32_0 : i32, i32
  }
  func.func @transform_2(%arg0: i32) -> (i32, i32) {
    %c0_i32 = arith.constant 0 : i32
    %c0_i32_0 = arith.constant 0 : i32
    %c0_i32_1 = arith.constant 0 : i32
    return %c0_i32, %c0_i32_0 : i32, i32
  }
  func.func @transform_3(%arg0: i32) -> (i32, i32) {
    %c0_i32 = arith.constant 0 : i32
    %c0_i32_0 = arith.constant 0 : i32
    %c0_i32_1 = arith.constant 0 : i32
    return %c0_i32, %c0_i32_0 : i32, i32
  }
  func.func @transform_4(%arg0: i32) -> (i32, i32) {
    %c0_i32 = arith.constant 0 : i32
    %c0_i32_0 = arith.constant 0 : i32
    %c0_i32_1 = arith.constant 0 : i32
    return %c0_i32, %c0_i32_0 : i32, i32
  }
  func.func @transform_5(%arg0: i32) -> (i32, i32) {
    %c0_i32 = arith.constant 0 : i32
    %c0_i32_0 = arith.constant 0 : i32
    return %c0_i32, %arg0 : i32, i32
  }
}

</mosaic_0001>

<bundles_post_ra>
// kernel: tpu_custom_call.1
= control target key start
LH: loop header
LB: loop body
LE: loop exit
PB: predicated region body
PF: predicated region fallthrough
CT: control target
= control target key end

     0   :  { %v792_v2 = vmov 3   ;;  %v793_v3 = vmov 0   ;;  %s1214_s0 = inlined_call_operand.vmem [shape: f32[4,128], index: 0, kind: input, shape index: {}]   ;;  %s1215_s1 = inlined_call_operand.vmem [shape: f32[128,4], index: 1, kind: input, shape index: {}]   ;;  %s1216_s2 = inlined_call_operand.vmem [shape: f32[128,1], index: 2, kind: input, shape index: {}]   ;;  %s1217_s3 = inlined_call_operand.vmem [shape: f32[8,128], index: 3, kind: input, shape index: {}]   ;;  %s1218_s4 = inlined_call_operand.vmem [shape: f32[8,1], index: 4, kind: input, shape index: {}]   ;;  %s1219_s5 = inlined_call_operand.hbm [shape: f32[8,128], index: 5, kind: output, shape index: {}]  }
   0x1   :  { %v37_v0 = vld [vmem:[%s1215_s1 + $0x78] sm:$0xff]  ;;  %v835_v1 = vld [vmem:[%s1215_s1 + $0x10] sm:$0xff]  ;;  %724 = vset.pattern.permute.xlu0 %v792_v2  ;;  %717 = vset.pattern.permute.xlu1 %v793_v3  ;;  %v843_v4 = vld [vmem:[%s1215_s1 + $0x60] sm:$0xff] }
   0x2   :  { %511 = vperm.xlu0 %724, %v37_v0   ;;  %66 = vperm.xlu1 %717, %v835_v1   ;;  %v848_v5 = vld [vmem:[%s1215_s1 + $0x18] sm:$0xff]  ;;  %v855_v6 = vld [vmem:[%s1215_s1 + $0x48] sm:$0xff] }
   0x3   :  { %v860_v7 = vld [vmem:[%s1215_s1 + $0x28] sm:$0xff] }
   0x6   :  { %499 = vperm.xlu0 %724, %v843_v4   ;;  %71 = vperm.xlu1 %717, %v848_v5  }
   0x7   :  { %10 = vsyncpa [#allocation3], 0  ;;  %v867_v8 = vld [vmem:[%s1215_s1 + $0x30] sm:$0xff]  ;;  %v794_v10 = vmov 1   ;;  %v795_v12 = vmov 2   ;;  %v35_v13 = vld [vmem:[%s1215_s1 + $0x68] sm:$0xff]  ;;  %v134_v51 = vlaneseq }
   0x8   :  { %v36_v9 = vld [vmem:[%s1215_s1 + $0x70] sm:$0xff]  ;;  %v892_v14 = vld [vmem:[%s1215_s1] sm:$0xff]  ;;  %v900_v15 = vld [vmem:[%s1215_s1 + $0x8] sm:$0xff]  ;;  %v796_v21 = vmov 0.0   ;;  %vm797_vm0 = vmmov 0   ;;  %s798_s9 = smov [#allocation2]  }
   0x9   :  { %v52_v11 = vld [vmem:[%s1216_s2 + $0x70] sm:$0xff]  ;;  %v907_v16 = vld [vmem:[%s1215_s1 + $0x20] sm:$0xff]  ;;  %v33_v17 = vld [vmem:[%s1215_s1 + $0x58] sm:$0xff]  ;;  %675 = vmatprep.subr.mxu0 %v796_v21  ;;  %v135_v54 = vshrl.u32 %v134_v51, 7  ;;  %707 = vmatprep.mubr.msk.f32.mxu0 %vm797_vm0, %v796_v21  ;;  %s650_s10 = sshll.u32 %s798_s9, 4  ;;  %s651_s10 = int_to_ptr.vmem [resolvable:$true] %s650_s10 }
   0xa   :  { %487 = vperm.xlu0 %724, %v855_v6   ;;  %81 = vperm.xlu1 %717, %v860_v7   ;;  %v50_v18 = vld [vmem:[%s1216_s2 + $0x60] sm:$0xff]  ;;  %v53_v19 = vld [vmem:[%s1216_s2 + $0x78] sm:$0xff]  ;;  %v51_v20 = vld [vmem:[%s1216_s2 + $0x68] sm:$0xff]  ;;  %s770_s11 = scalar_lea.vmem %s651_s10, 128  ;;  %p775_p1 = scmp.lt.s32.totalorder %s651_s10, %s651_s10 }
   0xb   :  { %v49_v22 = vld [vmem:[%s1216_s2 + $0x58] sm:$0xff]  ;;  %v32_v23 = vld [vmem:[%s1215_s1 + $0x50] sm:$0xff]  ;;  %v42_v27 = vld [vmem:[%s1216_s2 + $0x20] sm:$0xff]  ;;  %v136_v57 = vsub.s32 0, %v135_v54  ;;  %v316_v60 = vsub.s32 1, %v135_v54  ;;  %v516_v63 = vsub.s32 3, %v135_v54  ;;  %p771_p0 = scmp.ne.s32.totalorder %s651_s10, %s770_s11  ;;  %p776_p2 = scmp.lt.s32.totalorder %s770_s11, %s770_s11 }
   0xc   :  { %v48_v24 = vld [vmem:[%s1216_s2 + $0x50] sm:$0xff]  ;;  %v940_v25 = vld [vmem:[%s1215_s1 + $0x38] sm:$0xff]  ;;  %v39_v28 = vld [vmem:[%s1216_s2 + $0x8] sm:$0xff] }
   0xd   :  { %v45_v26 = vld [vmem:[%s1216_s2 + $0x38] sm:$0xff]  ;;  %v30_v29 = vld [vmem:[%s1215_s1 + $0x40] sm:$0xff]  ;;  %v47_v30 = vld [vmem:[%s1216_s2 + $0x48] sm:$0xff]  ;;  %p777_p3 = por %p776_p2, %p775_p1 }
   0xe   :  { %475 = vperm.xlu0 %724, %v867_v8   ;;  %126 = vperm.xlu1 %717, %v36_v9   ;;  %v46_v31 = vld [vmem:[%s1216_s2 + $0x40] sm:$0xff]  ;;  %v44_v42 = vld [vmem:[%s1216_s2 + $0x30] sm:$0xff]  ;;  %v43_v50 = vld [vmem:[%s1216_s2 + $0x28] sm:$0xff] }
   0xf   :  { %v21_v58 = vld [vmem:[%s1214_s0] sm:$0xf]  ;;  %p778_p4 = pnand %p777_p3, %p771_p0 }
  0x10   :  { %v1039_v62 = vrot.slane %v21_v58, %v136_v57 }
  0x12   :  { %751 = vset.pattern.permute.xlu0 %v794_v10  ;;  %718 = vset.pattern.permute.xlu1 %v794_v10 }
  0x13   :  { %307 = vperm.xlu0 %751, %v36_v9   ;;  %311 = vperm.xlu1 %718, %v37_v0  }
  0x17   :  { %299 = vperm.xlu0 %751, %v843_v4   ;;  %719 = vset.pattern.permute.xlu1 %v793_v3 }
  0x18   :  { %226 = vperm.xlu1 %719, %v52_v11   ;;  %v1048_v11 = vrot.slane %v21_v58, %v516_v63 }
  0x1b   :  { %287 = vperm.xlu0 %751, %v855_v6  }
  0x1c   :  { %720 = vset.pattern.permute.xlu1 %v795_v12 }
  0x1d   :  { %411 = vperm.xlu1 %720, %v37_v0  }
  0x1f   :  { %271 = vperm.xlu0 %751, %v860_v7  }
  0x21   :  { %721 = vset.pattern.permute.xlu1 %v793_v3 }
  0x22   :  { %116 = vperm.xlu1 %721, %v843_v4  }
  0x23   :  { %259 = vperm.xlu0 %751, %v835_v1  }
  0x26   :  { %722 = vset.pattern.permute.xlu1 %v794_v10 }
  0x27   :  { %756 = vset.pattern.permute.xlu0 %v793_v3  ;;  %303 = vperm.xlu1 %722, %v35_v13  }
  0x28   :  { %56 = vperm.xlu0 %756, %v892_v14  }
  0x2b   :  { %723 = vset.pattern.permute.xlu1 %v795_v12 }
  0x2c   :  { %407 = vperm.xlu1 %723, %v36_v9   ;;  %61 = vperm.xlu0 %756, %v900_v15  }
  0x30   :  { %725 = vset.pattern.permute.xlu1 %v793_v3  ;;  %76 = vperm.xlu0 %756, %v907_v16  }
  0x31   :  { %111 = vperm.xlu1 %725, %v33_v17  }
  0x34   :  { %131 = vperm.xlu0 %756, %v37_v0   ;;  %v416_v0 = vsub.s32 2, %v135_v54 }
  0x35   :  { %216 = vperm.xlu1 %725, %v50_v18  }
  0x38   :  { %231 = vperm.xlu0 %756, %v53_v19  }
  0x39   :  { %726 = vset.pattern.permute.xlu1 %v795_v12 }
  0x3a   :  { %403 = vperm.xlu1 %726, %v35_v13  }
  0x3c   :  { %121 = vperm.xlu0 %756, %v35_v13  }
  0x3e   :  { %727 = vset.pattern.permute.xlu1 %v792_v2 }
  0x3f   :  { %507 = vperm.xlu1 %727, %v36_v9  }
  0x40   :  { %221 = vperm.xlu0 %756, %v51_v20  }
  0x43   :  { %728 = vset.pattern.permute.xlu1 %v793_v3 }
  0x44   :  { %211 = vperm.xlu1 %728, %v49_v22   ;;  %106 = vperm.xlu0 %756, %v32_v23  }
  0x48   :  { %729 = vset.pattern.permute.xlu1 %v794_v10  ;;  %206 = vperm.xlu0 %756, %v48_v24  }
  0x49   :  { %295 = vperm.xlu1 %729, %v33_v17  }
  0x4c   :  { %91 = vperm.xlu0 %756, %v940_v25  }
  0x4d   :  { %730 = vset.pattern.permute.xlu1 %v792_v2 }
  0x4e   :  { %503 = vperm.xlu1 %730, %v35_v13   ;;  %v1050_v13 = vrot.slane %v21_v58, %v416_v0 }
  0x50   :  { %191 = vperm.xlu0 %756, %v45_v26  }
  0x52   :  { %731 = vset.pattern.permute.xlu1 %v793_v3 }
  0x53   :  { %101 = vperm.xlu1 %731, %v855_v6  }
  0x54   :  { %176 = vperm.xlu0 %756, %v42_v27  }
  0x57   :  { %732 = vset.pattern.permute.xlu1 %v794_v10 }
  0x58   :  { %291 = vperm.xlu1 %732, %v32_v23   ;;  %161 = vperm.xlu0 %756, %v39_v28  }
  0x5c   :  { %733 = vset.pattern.permute.xlu1 %v795_v12  ;;  %759 = vset.pattern.permute.xlu0 %v795_v12 }
  0x5d   :  { %395 = vperm.xlu1 %733, %v33_v17   ;;  %399 = vperm.xlu0 %759, %v843_v4  }
  0x61   :  { %734 = vset.pattern.permute.xlu1 %v793_v3  ;;  %387 = vperm.xlu0 %759, %v855_v6   ;;  %v1041_v6 = vrot.slane %v21_v58, %v316_v60 }
  0x62   :  { %96 = vperm.xlu1 %734, %v30_v29  }
  0x65   :  { %379 = vperm.xlu0 %759, %v940_v25  }
  0x66   :  { %201 = vperm.xlu1 %734, %v47_v30   ;;  %v41_v30 = vld [vmem:[%s1216_s2 + $0x18] sm:$0xff] }
  0x69   :  { %367 = vperm.xlu0 %759, %v907_v16  }
  0x6a   :  { %735 = vset.pattern.permute.xlu1 %v795_v12 }
  0x6b   :  { %391 = vperm.xlu1 %735, %v32_v23  }
  0x6d   :  { %355 = vperm.xlu0 %759, %v900_v15  }
  0x6f   :  { %736 = vset.pattern.permute.xlu1 %v792_v2 }
  0x70   :  { %495 = vperm.xlu1 %736, %v33_v17  }
  0x71   :  { %764 = vset.pattern.permute.xlu0 %v792_v2 }
  0x72   :  { %463 = vperm.xlu0 %764, %v848_v5  }
  0x74   :  { %737 = vset.pattern.permute.xlu1 %v793_v3 }
  0x75   :  { %196 = vperm.xlu1 %737, %v46_v31  }
  0x76   :  { %455 = vperm.xlu0 %764, %v900_v15  }
  0x79   :  { %738 = vset.pattern.permute.xlu1 %v794_v10 }
  0x7a   :  { %283 = vperm.xlu1 %738, %v30_v29   ;;  %769 = vset.pattern.permute.xlu0 %v793_v3 }
  0x7d   :  { %v981_v32 = vpop.permute.xlu1 %66  ;;  %v983_v33 = vpop.permute.xlu0 %511 }
  0x7e   :  { %739 = vset.pattern.permute.xlu1 %v792_v2 }
  0x7f   :  { %491 = vperm.xlu1 %739, %v32_v23  }
  0x81   :  { %v986_v34 = vpop.permute.xlu1 %71  ;;  %v988_v35 = vpop.permute.xlu0 %499 }
  0x83   :  { %740 = vset.pattern.permute.xlu1 %v793_v3 }
  0x84   :  { %86 = vperm.xlu1 %740, %v867_v8  }
  0x85   :  { %v992_v36 = vpop.permute.xlu1 %81  ;;  %v994_v37 = vpop.permute.xlu0 %487 }
  0x88   :  { %741 = vset.pattern.permute.xlu1 %v794_v10 }
  0x89   :  { %279 = vperm.xlu1 %741, %v940_v25   ;;  %v127_v38 = vpop.permute.xlu1 %126  ;;  %v998_v39 = vpop.permute.xlu0 %475 }
  0x8a   :  { %v152_v17 = vmul.f32 %v1039_v62, %v127_v38 }
  0x8d   :  { %742 = vset.pattern.permute.xlu1 %v795_v12 }
  0x8e   :  { %383 = vperm.xlu1 %742, %v30_v29   ;;  %v312_v40 = vpop.permute.xlu1 %311  ;;  %v308_v41 = vpop.permute.xlu0 %307 }
  0x8f   :  { %v333_v19 = vmul.f32 %v1041_v6, %v312_v40  ;;  %v332_v22 = vmul.f32 %v1041_v6, %v308_v41 }
  0x92   :  { %743 = vset.pattern.permute.xlu1 %v793_v3  ;;  %v1005_v43 = vpop.permute.xlu0 %299 }
  0x93   :  { %186 = vperm.xlu1 %743, %v44_v42   ;;  %v227_v44 = vpop.permute.xlu1 %226 }
  0x94   :  { %v248_v23 = vadd.f32 %v227_v44, %v152_v17  ;;  %v40_v17 = vld [vmem:[%s1216_s2 + $0x10] sm:$0xff] }
  0x96   :  { %v1007_v45 = vpop.permute.xlu0 %287  ;;  %v348_v38 = vadd.f32 %v332_v22, %v248_v23 }
  0x97   :  { %744 = vset.pattern.permute.xlu1 %v794_v10 }
  0x98   :  { %275 = vperm.xlu1 %744, %v867_v8   ;;  %v412_v46 = vpop.permute.xlu1 %411 }
  0x99   :  { %v433_v26 = vmul.f32 %v1050_v13, %v412_v46 }
  0x9a   :  { %v1011_v47 = vpop.permute.xlu0 %271 }
  0x9c   :  { %745 = vset.pattern.permute.xlu1 %v792_v2 }
  0x9d   :  { %483 = vperm.xlu1 %745, %v30_v29   ;;  %v1014_v48 = vpop.permute.xlu1 %116 }
  0x9e   :  { %v1016_v49 = vpop.permute.xlu0 %259 }
  0xa1   :  { %746 = vset.pattern.permute.xlu1 %v793_v3 }
  0xa2   :  { %181 = vperm.xlu1 %746, %v43_v50   ;;  %v1022_v52 = vpop.permute.xlu1 %303 }
  0xa3   :  { %v1024_v53 = vpop.permute.xlu0 %56  ;;  %v331_v63 = vmul.f32 %v1041_v6, %v1022_v52 }
  0xa6   :  { %747 = vset.pattern.permute.xlu1 %v795_v12 }
  0xa7   :  { %375 = vperm.xlu1 %747, %v867_v8   ;;  %v408_v55 = vpop.permute.xlu1 %407  ;;  %v1028_v56 = vpop.permute.xlu0 %61 }
  0xa8   :  { %v432_v28 = vmul.f32 %v1050_v13, %v408_v55 }
  0xaa   :  { %v448_v42 = vadd.f32 %v432_v28, %v348_v38 }
  0xab   :  { %748 = vset.pattern.permute.xlu1 %v792_v2  ;;  %v1034_v59 = vpop.permute.xlu0 %76 }
  0xac   :  { %479 = vperm.xlu1 %748, %v940_v25   ;;  %v1037_v61 = vpop.permute.xlu1 %111  ;;  %v533_v25 = vmul.f32 %v1048_v11, %v983_v33 }
  0xaf   :  { %v132_v4 = vpop.permute.xlu0 %131 }
  0xb0   :  { %v153_v8 = vmul.f32 %v1039_v62, %v132_v4  ;;  %749 = vset.pattern.permute.xlu1 %v794_v10  ;;  %v1045_v9 = vpop.permute.xlu1 %216 }
  0xb1   :  { %267 = vperm.xlu1 %749, %v907_v16  }
  0xb3   :  { %v232_v18 = vpop.permute.xlu0 %231 }
  0xb4   :  { %v249_v20 = vadd.f32 %v232_v18, %v153_v8 }
  0xb5   :  { %750 = vset.pattern.permute.xlu1 %v795_v12  ;;  %v404_v24 = vpop.permute.xlu1 %403 }
  0xb6   :  { %v349_v27 = vadd.f32 %v333_v19, %v249_v20  ;;  %371 = vperm.xlu1 %750, %v860_v7   ;;  %v431_v18 = vmul.f32 %v1050_v13, %v404_v24 }
  0xb7   :  { %v122_v29 = vpop.permute.xlu0 %121 }
  0xb8   :  { %v449_v31 = vadd.f32 %v433_v26, %v349_v27  ;;  %v151_v51 = vmul.f32 %v1039_v62, %v122_v29  ;;  %v139_v29 = vmul.f32 %v1039_v62, %v1028_v56 }
  0xba   :  { %752 = vset.pattern.permute.xlu1 %v793_v3  ;;  %v508_v40 = vpop.permute.xlu1 %507  ;;  %v549_v41 = vadd.f32 %v533_v25, %v449_v31 }
  0xbb   :  { %v532_v33 = vmul.f32 %v1048_v11, %v508_v40  ;;  %171 = vperm.xlu1 %752, %v41_v30   ;;  %v222_v44 = vpop.permute.xlu0 %221 }
  0xbc   :  { %v565_v46 = vmax.f32 %v549_v41, 0.0  ;;  %v247_v58 = vadd.f32 %v222_v44, %v151_v51  ;;  %v327_v51 = vmul.f32 %v1041_v6, %v1007_v45 }
  0xbd   :  { %v548_v50 = vadd.f32 %v532_v33, %v448_v42 }
  0xbe   :  { %676 = vmatpush3.msra.mxu0 %v565_v46  ;;  %v347_v4 = vadd.f32 %v331_v63, %v247_v58 }
  0xbf   :  { %v564_v54 = vmax.f32 %v548_v50, 0.0  ;;  %753 = vset.pattern.permute.xlu1 %v794_v10  ;;  %v1068_v55 = vpop.permute.xlu1 %211  ;;  %v1070_v57 = vpop.permute.xlu0 %106  ;;  %677 = vmatprep.subr.mxu0 %v796_v21 }
  0xc0   :  { %263 = vperm.xlu1 %753, %v848_v5   ;;  %v447_v22 = vadd.f32 %v431_v18, %v347_v4  ;;  %v527_v4 = vmul.f32 %v1048_v11, %v994_v37 }
  0xc1   :  { %678 = vmatpush3.msra.mxu0 %v564_v54  ;;  %v38_v54 = vld [vmem:[%s1216_s2] sm:$0xff] }
  0xc2   :  { %679 = vmatprep.subr.mxu0 %v796_v21 }
  0xc3   :  { %v1075_v60 = vpop.permute.xlu0 %206 }
  0xc4   :  { %754 = vset.pattern.permute.xlu1 %v792_v2  ;;  %v296_v0 = vpop.permute.xlu1 %295 }
  0xc5   :  { %471 = vperm.xlu1 %754, %v860_v7   ;;  %v142_v7 = vmul.f32 %v1039_v62, %v1034_v59  ;;  %v150_v59 = vmul.f32 %v1039_v62, %v1014_v48  ;;  %v530_v48 = vmul.f32 %v1048_v11, %v988_v35 }
  0xc7   :  { %v92_v8 = vpop.permute.xlu0 %91  ;;  %v246_v56 = vadd.f32 %v1045_v9, %v150_v59 }
  0xc8   :  { %v145_v19 = vmul.f32 %v1039_v62, %v92_v8  ;;  %v149_v8 = vmul.f32 %v1039_v62, %v1037_v61 }
  0xc9   :  { %755 = vset.pattern.permute.xlu1 %v793_v3  ;;  %v504_v20 = vpop.permute.xlu1 %503 }
  0xca   :  { %v531_v52 = vmul.f32 %v1048_v11, %v504_v20  ;;  %166 = vperm.xlu1 %755, %v40_v17   ;;  %v329_v17 = vmul.f32 %v1041_v6, %v296_v0  ;;  %v245_v20 = vadd.f32 %v1068_v55, %v149_v8 }
  0xcb   :  { %v192_v23 = vpop.permute.xlu0 %191 }
  0xcc   :  { %v547_v25 = vadd.f32 %v531_v52, %v447_v22  ;;  %v1090_v26 = vadd.f32 %v192_v23, %v145_v19  ;;  %v345_v23 = vadd.f32 %v329_v17, %v245_v20 }
  0xce   :  { %v563_v27 = vmax.f32 %v547_v25, 0.0  ;;  %757 = vset.pattern.permute.xlu1 %v795_v12  ;;  %v102_v24 = vpop.permute.xlu1 %101 }
  0xcf   :  { %363 = vperm.xlu1 %757, %v848_v5   ;;  %v177_v28 = vpop.permute.xlu0 %176  ;;  %v330_v5 = vmul.f32 %v1041_v6, %v1005_v43  ;;  %v147_v35 = vmul.f32 %v1039_v62, %v102_v24 }
  0xd0   :  { %v1096_v30 = vadd.f32 %v177_v28, %v142_v7  ;;  %680 = vmatpush3.msra.mxu0 %v563_v27 }
  0xd1   :  { %681 = vmatprep.subr.mxu0 %v796_v21  ;;  %v346_v33 = vadd.f32 %v330_v5, %v246_v56 }
  0xd3   :  { %758 = vset.pattern.permute.xlu1 %v792_v2  ;;  %v292_v31 = vpop.permute.xlu1 %291  ;;  %v162_v38 = vpop.permute.xlu0 %161 }
  0xd4   :  { %467 = vperm.xlu1 %758, %v907_v16   ;;  %v1103_v40 = vadd.f32 %v162_v38, %v139_v29  ;;  %v328_v24 = vmul.f32 %v1041_v6, %v292_v31 }
  0xd8   :  { %760 = vset.pattern.permute.xlu1 %v794_v10  ;;  %v396_v41 = vpop.permute.xlu1 %395  ;;  %v400_v42 = vpop.permute.xlu0 %399 }
  0xd9   :  { %v430_v44 = vmul.f32 %v1050_v13, %v400_v42  ;;  %255 = vperm.xlu1 %760, %v900_v15   ;;  %v429_v22 = vmul.f32 %v1050_v13, %v396_v41 }
  0xdb   :  { %v446_v16 = vadd.f32 %v430_v44, %v346_v33  ;;  %v445_v37 = vadd.f32 %v429_v22, %v345_v23 }
  0xdc   :  { %v388_v50 = vpop.permute.xlu0 %387 }
  0xdd   :  { %v1113_v46 = vpop.permute.xlu1 %96  ;;  %761 = vset.pattern.permute.xlu1 %v795_v12  ;;  %v546_v43 = vadd.f32 %v530_v48, %v446_v16  ;;  %v427_v63 = vmul.f32 %v1050_v13, %v388_v50 }
  0xde   :  { %359 = vperm.xlu1 %761, %v835_v1   ;;  %v146_v42 = vmul.f32 %v1039_v62, %v1113_v46 }
  0xdf   :  { %v562_v9 = vmax.f32 %v546_v43, 0.0 }
  0xe1   :  { %v202_v15 = vpop.permute.xlu1 %201  ;;  %682 = vmatpush3.msra.mxu0 %v562_v9 }
  0xe2   :  { %v243_v58 = vadd.f32 %v202_v15, %v147_v35  ;;  %762 = vset.pattern.permute.xlu1 %v793_v3  ;;  %683 = vmatprep.subr.mxu0 %v796_v21 }
  0xe3   :  { %156 = vperm.xlu1 %762, %v38_v54  }
  0xe4   :  { %v343_v45 = vadd.f32 %v327_v51, %v243_v58 }
  0xe6   :  { %v443_v18 = vadd.f32 %v427_v63, %v343_v45  ;;  %v392_v19 = vpop.permute.xlu1 %391  ;;  %v380_v63 = vpop.permute.xlu0 %379 }
  0xe7   :  { %763 = vset.pattern.permute.xlu1 %v794_v10  ;;  %v148_v10 = vmul.f32 %v1039_v62, %v1070_v57  ;;  %v567_v57 = vld [vmem:[%s1218_s4] sm:$0xff] }
  0xe8   :  { %251 = vperm.xlu1 %763, %v892_v14   ;;  %v543_v52 = vadd.f32 %v527_v4, %v443_v18  ;;  %v425_v18 = vmul.f32 %v1050_v13, %v380_v63 }
  0xe9   :  { %v244_v55 = vadd.f32 %v1075_v60, %v148_v10 }
  0xeb   :  { %v496_v7 = vpop.permute.xlu1 %495  ;;  %v344_v29 = vadd.f32 %v328_v24, %v244_v55  ;;  %v143_v55 = vmul.f32 %v1039_v62, %v992_v36  ;;  %v141_v36 = vmul.f32 %v1039_v62, %v986_v34 }
  0xec   :  { %v529_v25 = vmul.f32 %v1048_v11, %v496_v7  ;;  %765 = vset.pattern.permute.xlu1 %v792_v2 }
  0xed   :  { %459 = vperm.xlu1 %765, %v835_v1   ;;  %v428_v1 = vmul.f32 %v1050_v13, %v392_v19 }
  0xee   :  { %v545_v61 = vadd.f32 %v529_v25, %v445_v37 }
  0xef   :  { %v444_v59 = vadd.f32 %v428_v1, %v344_v29 }
  0xf0   :  { %v561_v0 = vmax.f32 %v545_v61, 0.0  ;;  %v197_v27 = vpop.permute.xlu1 %196 }
  0xf1   :  { %766 = vset.pattern.permute.xlu1 %v795_v12  ;;  %v242_v33 = vadd.f32 %v197_v27, %v146_v42 }
  0xf2   :  { %351 = vperm.xlu1 %766, %v892_v14   ;;  %684 = vmatpush3.msra.mxu0 %v561_v0 }
  0xf3   :  { %685 = vmatprep.subr.mxu0 %v796_v21 }
  0xf5   :  { %v284_v28 = vpop.permute.xlu1 %283 }
  0xf6   :  { %767 = vset.pattern.permute.xlu1 %v792_v2  ;;  %v326_v48 = vmul.f32 %v1041_v6, %v284_v28  ;;  %v323_v28 = vmul.f32 %v1041_v6, %v1011_v47 }
  0xf7   :  { %451 = vperm.xlu1 %767, %v892_v14   ;;  %v559_v14 = vmax.f32 %v543_v52, 0.0  ;;  %v524_v52 = vmul.f32 %v1048_v11, %v998_v39 }
  0xf8   :  { %v342_v16 = vadd.f32 %v326_v48, %v242_v33 }
  0xfa   :  { %v492_v12 = vpop.permute.xlu1 %491 }
  0xfb   :  { %v528_v60 = vmul.f32 %v1048_v11, %v492_v12  ;;  %768 = vset.pattern.permute.xlu1 %v793_v3 }
  0xfc   :  { %570 = vperm.xlu1 %768, %v567_v57   ;;  %v368_v57 = vpop.permute.xlu0 %367 }
  0xfd   :  { %v544_v2 = vadd.f32 %v528_v60, %v444_v59  ;;  %v422_v33 = vmul.f32 %v1050_v13, %v368_v57 }
  0xff   :  { %v560_v31 = vmax.f32 %v544_v2, 0.0  ;;  %v87_v38 = vpop.permute.xlu1 %86 }
 0x100   :  { %v144_v15 = vmul.f32 %v1039_v62, %v87_v38 }
 0x101   :  { %686 = vmatpush3.msra.mxu0 %v560_v31 }
 0x102   :  { %687 = vmatprep.subr.mxu0 %v796_v21 }
 0x103   :  { %688 = vmatpush3.msra.mxu0 %v559_v14  ;;  %v356_v14 = vpop.permute.xlu0 %355 }
 0x104   :  { %v280_v5 = vpop.permute.xlu1 %279  ;;  %689 = vmatprep.subr.mxu0 %v796_v21 }
 0x105   :  { %v325_v58 = vmul.f32 %v1041_v6, %v280_v5 }
 0x107   :  { %v341_v17 = vadd.f32 %v325_v58, %v1090_v26  ;;  %v464_v48 = vpop.permute.xlu0 %463 }
 0x109   :  { %v384_v56 = vpop.permute.xlu1 %383  ;;  %v441_v23 = vadd.f32 %v425_v18, %v341_v17 }
 0x10a   :  { %v426_v44 = vmul.f32 %v1050_v13, %v384_v56 }
 0x10c   :  { %v442_v9 = vadd.f32 %v426_v44, %v342_v16 }
 0x10e   :  { %v187_v41 = vpop.permute.xlu1 %186 }
 0x10f   :  { %v240_v4 = vadd.f32 %v187_v41, %v144_v15 }
 0x113   :  { %v276_v3 = vpop.permute.xlu1 %275 }
 0x114   :  { %v324_v46 = vmul.f32 %v1041_v6, %v276_v3 }
 0x116   :  { %v340_v19 = vadd.f32 %v324_v46, %v240_v4  ;;  %v140_v4 = vmul.f32 %v1039_v62, %v981_v32 }
 0x118   :  { %v484_v43 = vpop.permute.xlu1 %483 }
 0x119   :  { %v526_v50 = vmul.f32 %v1048_v11, %v484_v43  ;;  %v521_v43 = vmul.f32 %v1048_v11, %v464_v48 }
 0x11b   :  { %v542_v51 = vadd.f32 %v526_v50, %v442_v9 }
 0x11d   :  { %v558_v35 = vmax.f32 %v542_v51, 0.0  ;;  %v182_v54 = vpop.permute.xlu1 %181 }
 0x11e   :  { %v239_v39 = vadd.f32 %v182_v54, %v143_v55 }
 0x11f   :  { %690 = vmatpush3.msra.mxu0 %v558_v35 }
 0x120   :  { %691 = vmatprep.subr.mxu0 %v796_v21  ;;  %v339_v29 = vadd.f32 %v323_v28, %v239_v39 }
 0x122   :  { %v376_v45 = vpop.permute.xlu1 %375 }
 0x123   :  { %v424_v8 = vmul.f32 %v1050_v13, %v376_v45 }
 0x125   :  { %v440_v20 = vadd.f32 %v424_v8, %v340_v19  ;;  %v419_v8 = vmul.f32 %v1050_v13, %v356_v14  ;;  %v456_v19 = vpop.permute.xlu0 %455 }
 0x127   :  { %v480_v22 = vpop.permute.xlu1 %479  ;;  %v540_v25 = vadd.f32 %v524_v52, %v440_v20  ;;  %v320_v20 = vmul.f32 %v1041_v6, %v1016_v49 }
 0x128   :  { %v525_v7 = vmul.f32 %v1048_v11, %v480_v22 }
 0x129   :  { %v556_v27 = vmax.f32 %v540_v25, 0.0 }
 0x12a   :  { %v541_v37 = vadd.f32 %v525_v7, %v441_v23  ;;  %v519_v7 = vmul.f32 %v1048_v11, %v456_v19 }
 0x12c   :  { %v557_v61 = vmax.f32 %v541_v37, 0.0  ;;  %v268_v0 = vpop.permute.xlu1 %267 }
 0x12d   :  { %v322_v5 = vmul.f32 %v1041_v6, %v268_v0 }
 0x12e   :  { %692 = vmatpush3.msra.mxu0 %v557_v61 }
 0x12f   :  { %693 = vmatprep.subr.mxu0 %v796_v21  ;;  %v338_v3 = vadd.f32 %v322_v5, %v1096_v30 }
 0x130   :  { %694 = vmatpush3.msra.mxu0 %v556_v27 }
 0x131   :  { %v372_v26 = vpop.permute.xlu1 %371  ;;  %695 = vmatprep.subr.mxu0 %v796_v21  ;;  %v438_v9 = vadd.f32 %v422_v33, %v338_v3 }
 0x132   :  { %v423_v1 = vmul.f32 %v1050_v13, %v372_v26 }
 0x134   :  { %v439_v59 = vadd.f32 %v423_v1, %v339_v29 }
 0x136   :  { %v172_v10 = vpop.permute.xlu1 %171 }
 0x137   :  { %v237_v56 = vadd.f32 %v172_v10, %v141_v36 }
 0x13b   :  { %v264_v24 = vpop.permute.xlu1 %263 }
 0x13c   :  { %v321_v47 = vmul.f32 %v1041_v6, %v264_v24 }
 0x13e   :  { %v337_v44 = vadd.f32 %v321_v47, %v237_v56 }
 0x140   :  { %v472_v12 = vpop.permute.xlu1 %471 }
 0x141   :  { %v523_v60 = vmul.f32 %v1048_v11, %v472_v12 }
 0x143   :  { %v539_v2 = vadd.f32 %v523_v60, %v439_v59 }
 0x145   :  { %v555_v31 = vmax.f32 %v539_v2, 0.0  ;;  %v167_v38 = vpop.permute.xlu1 %166 }
 0x146   :  { %v236_v45 = vadd.f32 %v167_v38, %v140_v4 }
 0x147   :  { %696 = vmatpush3.msra.mxu0 %v555_v31 }
 0x148   :  { %697 = vmatprep.subr.mxu0 %v796_v21  ;;  %v336_v52 = vadd.f32 %v320_v20, %v236_v45 }
 0x14a   :  { %v364_v41 = vpop.permute.xlu1 %363 }
 0x14b   :  { %v421_v42 = vmul.f32 %v1050_v13, %v364_v41 }
 0x14d   :  { %v437_v16 = vadd.f32 %v421_v42, %v337_v44 }
 0x14f   :  { %v468_v34 = vpop.permute.xlu1 %467  ;;  %v537_v51 = vadd.f32 %v521_v43, %v437_v16 }
 0x150   :  { %v522_v50 = vmul.f32 %v1048_v11, %v468_v34 }
 0x151   :  { %v553_v58 = vmax.f32 %v537_v51, 0.0 }
 0x152   :  { %v538_v35 = vadd.f32 %v522_v50, %v438_v9 }
 0x154   :  { %v554_v54 = vmax.f32 %v538_v35, 0.0  ;;  %v256_v15 = vpop.permute.xlu1 %255 }
 0x155   :  { %v319_v63 = vmul.f32 %v1041_v6, %v256_v15 }
 0x156   :  { %698 = vmatpush3.msra.mxu0 %v554_v54 }
 0x157   :  { %699 = vmatprep.subr.mxu0 %v796_v21  ;;  %v335_v17 = vadd.f32 %v319_v63, %v1103_v40  ;;  %v138_v40 = vmul.f32 %v1039_v62, %v1024_v53 }
 0x158   :  { %700 = vmatpush3.msra.mxu0 %v553_v58 }
 0x159   :  { %v360_v30 = vpop.permute.xlu1 %359  ;;  %701 = vmatprep.subr.mxu0 %v796_v21  ;;  %v435_v23 = vadd.f32 %v419_v8, %v335_v17 }
 0x15a   :  { %v420_v22 = vmul.f32 %v1050_v13, %v360_v30 }
 0x15b   :  { %v535_v61 = vadd.f32 %v519_v7, %v435_v23 }
 0x15c   :  { %v436_v25 = vadd.f32 %v420_v22, %v336_v52 }
 0x15d   :  { %v551_v49 = vmax.f32 %v535_v61, 0.0 }
 0x15e   :  { %v157_v46 = vpop.permute.xlu1 %156 }
 0x15f   :  { %v234_v55 = vadd.f32 %v157_v46, %v138_v40 }
 0x163   :  { %v252_v18 = vpop.permute.xlu1 %251 }
 0x164   :  { %v318_v27 = vmul.f32 %v1041_v6, %v252_v18  ;;  %v566_v6 = vld [vmem:[%s1217_s3] sm:$0xff] }
 0x166   :  { %v334_v24 = vadd.f32 %v318_v27, %v234_v55 }
 0x168   :  { %v460_v37 = vpop.permute.xlu1 %459 }
 0x169   :  { %v520_v32 = vmul.f32 %v1048_v11, %v460_v37 }
 0x16b   :  { %v536_v0 = vadd.f32 %v520_v32, %v436_v25 }
 0x16d   :  { %v552_v26 = vmax.f32 %v536_v0, 0.0  ;;  %v352_v10 = vpop.permute.xlu1 %351 }
 0x16e   :  { %v418_v39 = vmul.f32 %v1050_v13, %v352_v10 }
 0x16f   :  { %702 = vmatpush3.msra.mxu0 %v552_v26 }
 0x170   :  { %703 = vmatprep.subr.mxu0 %v796_v21  ;;  %v434_v1 = vadd.f32 %v418_v39, %v334_v24 }
 0x171   :  { %704 = vmatpush3.msra.mxu0 %v551_v49 }
 0x172   :  { %v452_v28 = vpop.permute.xlu1 %451  ;;  %705 = vmatprep.subr.mxu0 %v796_v21 }
 0x173   :  { %v518_v29 = vmul.f32 %v1048_v11, %v452_v28 }
 0x175   :  { %v534_v53 = vadd.f32 %v518_v29, %v434_v1 }
 0x177   :  { %v550_v62 = vmax.f32 %v534_v53, 0.0  ;;  %v571_v13 = vpop.permute.xlu1 %570 }
 0x179   :  { %706 = vmatpush3.msra.mxu0 %v550_v62 }
 0x17a   :  { %708 = vmatmul.mubr.f32.vlgmr.msra.gmra.mxu0 %v566_v6 }
 0x23a   :  { %v639_v12 = vpop.f32.mrf.mxu0 }
 0x23b   :  { %v640_v57 = vadd.f32 %v639_v12, %v571_v13 }
 0x23c   :  { %v709_v59 = vpop.f32.mrf.mxu0 }
 0x23d   :  { %643 = vst [vmem:[#allocation2] sm:$0xff] %v640_v57 }
 0x23e   :  { %781 = shalt.err (!%p778_p4)
}
 0x23f   :  { %653 = dma.vmem_to_hbm [thread:$0]  %s651_s10, 128, %s1219_s5, [#allocation3]  }
 0x240   :  { %790 = dma.done.wait [#allocation3], 128  }
 0x241   :  { %791 = vsyncadd [#allocation3], 4294967168 }
 0x242   :  { %657 = vsyncpa [#allocation3], 1 }

</bundles_post_ra>
